<compile_context>
chip_gen: v5e
topology: v5e:2x2
jax: 0.10.0
libtpu: 0.0.40
codegen_flags: <defaults>
</compile_context>

<pallas_src>
import functools
import math

import jax
import jax.numpy as jnp
from jax import lax
from jax.experimental import pallas as pl
from jax.experimental.pallas import tpu as pltpu

_EPS = 1e-5
_VMEM_BUDGET_BYTES = 8 << 20    # per-tile working set (dbl-buffered I/O + f32 temps)
_VMEM_LIMIT_BYTES = 24 << 20    # scoped VMEM limit (well under v7x's 64 MiB per-TC)
_MAX_TM = 2048                  # row-tile cap (HBM roofline saturates well below this)
_MIN_GRID_STEPS = 4             # keep pipelining + 2-TC sharding alive on big inputs
_PIPELINE_BYTES = 2 << 20       # below this, a short grid isn't worth per-step overhead
_MAX_PACK_LANES = 512           # max super-row width W = lcm(C, 128) for the packed path


def _round_up(x, m):
    return ((x + m - 1) // m) * m


def _pick_tm(n_rows, lane_width, itemsize):
    """Row-tile size: budget-limited, capped, and >= _MIN_GRID_STEPS steps when large."""
    align = max(8, 32 // itemsize)                       # sublane packing: 8 f32, 16 bf16
    per_row = lane_width * (4 * itemsize + 3 * 4)        # 2x dbl-buffered in+out + ~3 f32 temps
    tm = min(max(_VMEM_BUDGET_BYTES // per_row, align), _MAX_TM)
    if n_rows * lane_width * itemsize >= _PIPELINE_BYTES:
        tm = min(tm, _round_up(pl.cdiv(n_rows, _MIN_GRID_STEPS), align))
    tm = max(align, (tm // align) * align)
    if tm >= n_rows:
        return n_rows                                    # tiny input: one full-extent block
    return tm


def _ln_grouped_kernel(x_ref, wb_ref, ones_ref, o_ref, *, inv_c, num_groups):
    # C % 128 == 0. x_ref: (TM, C); wb_ref: (2, C) f32; ones_ref: (128, 128) f32.
    # Fold the C/128 lane groups on the VPU, then one (128,128) all-ones matmul
    # gives the row sum already broadcast to every lane (MXU; XLU untouched).
    wb = wb_ref[...]
    ones128 = ones_ref[...]
    xg = [x_ref[:, i * 128:(i + 1) * 128].astype(jnp.float32) for i in range(num_groups)]
    folded = xg[0]
    for g in xg[1:]:
        folded = folded + g
    mu = jnp.dot(folded, ones128, preferred_element_type=jnp.float32) * inv_c
    xc = [g - mu for g in xg]
    f2 = xc[0] * xc[0]
    for c in xc[1:]:
        f2 = f2 + c * c
    var = jnp.dot(f2, ones128, preferred_element_type=jnp.float32) * inv_c
    r = lax.rsqrt(var + _EPS)
    for i in range(num_groups):
        w = wb[0:1, i * 128:(i + 1) * 128]
        b = wb[1:2, i * 128:(i + 1) * 128]
        o_ref[:, i * 128:(i + 1) * 128] = (xc[i] * r * w + b).astype(o_ref.dtype)


def _ln_packed_kernel(x_ref, wb_ref, seg_ref, o_ref, *, inv_c):
    # x_ref: (TM, W) -- each W-lane super-row packs G = W // C whole logical rows.
    # seg_ref: (W, W) block-diagonal 0/1 f32; x @ seg = per-segment sums broadcast
    # back to every lane of the segment (MXU; keeps VPU/XLU free, stores full-lane).
    # TODO(synk): pass seg as bf16 (exact, fewer MXU passes) once mixed-dtype
    # f32 x bf16 matmul lowering is available in Mosaic.
    x = x_ref[...].astype(jnp.float32)
    seg = seg_ref[...]
    wb = wb_ref[...]
    mu = jnp.dot(x, seg, preferred_element_type=jnp.float32) * inv_c
    xc = x - mu
    var = jnp.dot(xc * xc, seg, preferred_element_type=jnp.float32) * inv_c
    y = xc * lax.rsqrt(var + _EPS) * wb[0:1, :] + wb[1:2, :]
    o_ref[...] = y.astype(o_ref.dtype)


def _ln_rowwise_kernel(x_ref, wb_ref, o_ref):
    # General fallback (any C): plain last-axis reduction.
    x = x_ref[...].astype(jnp.float32)
    wb = wb_ref[...]
    mu = jnp.mean(x, axis=-1, keepdims=True)
    xc = x - mu
    var = jnp.mean(xc * xc, axis=-1, keepdims=True)     # biased variance (unbiased=False)
    y = xc * lax.rsqrt(var + _EPS) * wb[0:1, :] + wb[1:2, :]
    o_ref[...] = y.astype(o_ref.dtype)


def with_bias_layernorm(x, weight, bias):
    """x: (..., C); weight, bias: (C,). Returns same shape/dtype as x."""
    orig_shape = x.shape
    C = orig_shape[-1]
    assert weight.shape == (C,) and bias.shape == (C,)

    n_rows = 1
    for d in orig_shape[:-1]:
        n_rows *= d
    if n_rows == 0:
        return x

    itemsize = jnp.dtype(x.dtype).itemsize
    w32 = weight.astype(jnp.float32)
    b32 = bias.astype(jnp.float32)

    cp = pltpu.CompilerParams(
        # v7x: shard the row loop across both TensorCores.  (If profiling shows a
        # single TC doing all steps, switch to an explicit core axis / CORE_PARALLEL.)
        dimension_semantics=("parallel",),
        vmem_limit_bytes=_VMEM_LIMIT_BYTES,
    )

    if C % 128 == 0:
        # Lane-dense already: VPU-fold lane groups + one (128,128) ones matmul.
        num_groups = C // 128
        x2 = x.reshape(-1, C)
        tm = _pick_tm(n_rows, C, itemsize)
        wb = jnp.stack([w32, b32], axis=0)                      # (2, C)
        ones128 = jnp.ones((128, 128), jnp.float32)
        out = pl.pallas_call(
            functools.partial(_ln_grouped_kernel, inv_c=1.0 / C, num_groups=num_groups),
            out_shape=jax.ShapeDtypeStruct((n_rows, C), x.dtype),
            grid_spec=pltpu.PrefetchScalarGridSpec(
                num_scalar_prefetch=0,
                grid=(pl.cdiv(n_rows, tm),),
                in_specs=[
                    pl.BlockSpec((tm, C), lambda i: (i, 0)),
                    pl.BlockSpec((2, C), lambda i: (0, 0)),
                    pl.BlockSpec((128, 128), lambda i: (0, 0)),
                ],
                out_specs=pl.BlockSpec((tm, C), lambda i: (i, 0)),
            ),
            compiler_params=cp,
        )(x2, wb, ones128)
        return out.reshape(orig_shape)

    # Packed path: W = lcm(C, 128) super-rows of G whole logical rows each.
    W = (C * 128) // math.gcd(C, 128)
    G = W // C
    if W <= _MAX_PACK_LANES and (n_rows % G == 0):
        x2 = x.reshape(-1, W)                                   # row-major -> free repack
        nr = x2.shape[0]
        tm = _pick_tm(nr, W, itemsize)
        lane = jnp.arange(W, dtype=jnp.int32)
        seg = (lane[:, None] // C == lane[None, :] // C).astype(jnp.float32)
        wb = jnp.stack([jnp.tile(w32, G), jnp.tile(b32, G)], axis=0)   # (2, W)
        out = pl.pallas_call(
            functools.partial(_ln_packed_kernel, inv_c=1.0 / C),
            out_shape=jax.ShapeDtypeStruct((nr, W), x.dtype),
            grid_spec=pltpu.PrefetchScalarGridSpec(
                num_scalar_prefetch=0,
                grid=(pl.cdiv(nr, tm),),
                in_specs=[
                    pl.BlockSpec((tm, W), lambda i: (i, 0)),
                    pl.BlockSpec((2, W), lambda i: (0, 0)),
                    pl.BlockSpec((W, W), lambda i: (0, 0)),
                ],
                out_specs=pl.BlockSpec((tm, W), lambda i: (i, 0)),
            ),
            compiler_params=cp,
        )(x2, wb, seg)
        return out.reshape(orig_shape)

    # General fallback: any C / row count.
    x2 = x.reshape(-1, C)
    tm = _pick_tm(n_rows, C, itemsize)
    wb = jnp.stack([w32, b32], axis=0)                          # (2, C)
    out = pl.pallas_call(
        _ln_rowwise_kernel,
        out_shape=jax.ShapeDtypeStruct((n_rows, C), x.dtype),
        grid_spec=pltpu.PrefetchScalarGridSpec(
            num_scalar_prefetch=0,
            grid=(pl.cdiv(n_rows, tm),),
            in_specs=[
                pl.BlockSpec((tm, C), lambda i: (i, 0)),
                pl.BlockSpec((2, C), lambda i: (0, 0)),
            ],
            out_specs=pl.BlockSpec((tm, C), lambda i: (i, 0)),
        ),
        compiler_params=cp,
    )(x2, wb)
    return out.reshape(orig_shape)


def _reference(x, weight, bias):
    x32 = x.astype(jnp.float32)
    mu = jnp.mean(x32, axis=-1, keepdims=True)
    var = jnp.mean((x32 - mu) ** 2, axis=-1, keepdims=True)
    return ((x32 - mu) / jnp.sqrt(var + _EPS) * weight.astype(jnp.float32)
            + bias.astype(jnp.float32)).astype(x.dtype)


def _check(x, weight, bias, tol):
    y = jax.block_until_ready(with_bias_layernorm(x, weight, bias))
    y_ref = _reference(x, weight, bias)
    assert y.shape == x.shape and y.dtype == x.dtype
    err = float(jnp.max(jnp.abs(y.astype(jnp.float32) - y_ref.astype(jnp.float32))))
    assert err < tol, f"max abs err {err} >= {tol} for shape {x.shape} dtype {x.dtype}"


if __name__ == "__main__":
    key = jax.random.PRNGKey(0)
    k = jax.random.split(key, 10)

    # Case 1: Restormer-style C=48 -> packed path (W=384, G=8).
    C = 48
    x = jax.random.normal(k[0], (2, 8, 8, C), dtype=jnp.float32)
    w = 1.0 + 0.1 * jax.random.normal(k[1], (C,), dtype=jnp.float32)
    b = 0.1 * jax.random.normal(k[2], (C,), dtype=jnp.float32)
    _check(x, w, b, 5e-5)

    # Case 2: C=256 (multiple of 128) -> grouped fold + ones-matmul path.
    C2 = 256
    x2 = jax.random.normal(k[3], (2, 4, C2), dtype=jnp.float32)
    w2 = 1.0 + 0.1 * jax.random.normal(k[4], (C2,), dtype=jnp.float32)
    b2 = 0.1 * jax.random.normal(k[5], (C2,), dtype=jnp.float32)
    _check(x2, w2, b2, 5e-5)

    # Case 3: C=40 (lcm(40,128)=640 > cap) -> rowwise fallback.
    C3 = 40
    x3 = jax.random.normal(k[6], (2, 5, C3), dtype=jnp.float32)
    _check(x3, jnp.ones((C3,), jnp.float32), jnp.zeros((C3,), jnp.float32), 5e-5)

    # Case 4: C=48 but row count not divisible by G -> rowwise fallback.
    x4 = jax.random.normal(k[7], (1, 7, C), dtype=jnp.float32)
    _check(x4, w, b, 5e-5)

    # Case 5: bf16 input, C=96 -> packed path (W=384, G=4).
    C5 = 96
    x5 = jax.random.normal(k[8], (2, 16, C5), dtype=jnp.float32).astype(jnp.bfloat16)
    w5 = 1.0 + 0.1 * jax.random.normal(k[9], (C5,), dtype=jnp.float32)
    b5 = jnp.zeros((C5,), dtype=jnp.float32)
    _check(x5, w5, b5, 5e-2)   # output rounded to bf16 -> one-ulp tolerance

    print("KERNEL_OK")
</pallas_src>

<mosaic_0001>
module attributes {stable_mosaic.version = 11 : i64} {
  func.func @_ln_packed_kernel(%arg0: i32, %arg1: memref<16x384xf32, #tpu.memory_space<vmem>>, %arg2: memref<2x384xf32, #tpu.memory_space<vmem>>, %arg3: memref<384x384xf32, #tpu.memory_space<vmem>>, %arg4: memref<16x384xf32, #tpu.memory_space<vmem>>) attributes {dimension_semantics = [#tpu.dimension_semantics<parallel>], iteration_bounds = array<i64: 1>, scalar_prefetch = 0 : i64, scratch_operands = 0 : i64, tpu.core_type = #tpu.core_type<tc>, window_params = [{transform_indices = @transform_0, window_bounds = array<i64: 16, 384>}, {pipeline_mode = #tpu.pipeline_mode<synchronous>, transform_indices = @transform_1, window_bounds = array<i64: 2, 384>}, {pipeline_mode = #tpu.pipeline_mode<synchronous>, transform_indices = @transform_2, window_bounds = array<i64: 384, 384>}, {transform_indices = @transform_3, window_bounds = array<i64: 16, 384>}]} {
    %c0 = arith.constant 0 : index
    %c0_0 = arith.constant 0 : index
    %0 = vector.load %arg1[%c0, %c0_0] : memref<16x384xf32, #tpu.memory_space<vmem>>, vector<16x384xf32>
    %c0_1 = arith.constant 0 : index
    %c0_2 = arith.constant 0 : index
    %1 = vector.load %arg3[%c0_1, %c0_2] : memref<384x384xf32, #tpu.memory_space<vmem>>, vector<384x384xf32>
    %c0_3 = arith.constant 0 : index
    %c0_4 = arith.constant 0 : index
    %2 = vector.load %arg2[%c0_3, %c0_4] : memref<2x384xf32, #tpu.memory_space<vmem>>, vector<2x384xf32>
    %cst = arith.constant dense<0.000000e+00> : vector<16x384xf32>
    %3 = tpu.matmul %0, %1, %cst {dimension_numbers = #tpu.dot_dimension_numbers<[1], [0], [0], [1], [0, 0, 1, 1], [], []>} : vector<16x384xf32>, vector<384x384xf32>, vector<16x384xf32> -> vector<16x384xf32>
    %cst_5 = arith.constant 0.020833334 : f32
    %4 = vector.broadcast %cst_5 : f32 to vector<16x384xf32>
    %5 = arith.mulf %3, %4 : vector<16x384xf32>
    %6 = arith.subf %0, %5 : vector<16x384xf32>
    %7 = arith.mulf %6, %6 : vector<16x384xf32>
    %cst_6 = arith.constant dense<0.000000e+00> : vector<16x384xf32>
    %8 = tpu.matmul %7, %1, %cst_6 {dimension_numbers = #tpu.dot_dimension_numbers<[1], [0], [0], [1], [0, 0, 1, 1], [], []>} : vector<16x384xf32>, vector<384x384xf32>, vector<16x384xf32> -> vector<16x384xf32>
    %cst_7 = arith.constant 0.020833334 : f32
    %9 = vector.broadcast %cst_7 : f32 to vector<16x384xf32>
    %10 = arith.mulf %8, %9 : vector<16x384xf32>
    %cst_8 = arith.constant 9.99999974E-6 : f32
    %11 = vector.broadcast %cst_8 : f32 to vector<16x384xf32>
    %12 = arith.addf %10, %11 : vector<16x384xf32>
    %13 = math.rsqrt %12 : vector<16x384xf32>
    %14 = arith.mulf %6, %13 : vector<16x384xf32>
    %15 = vector.extract_strided_slice %2 {offsets = [0, 0], sizes = [1, 384], strides = [1, 1]} : vector<2x384xf32> to vector<1x384xf32>
    %16 = vector.broadcast %15 : vector<1x384xf32> to vector<16x384xf32>
    %17 = arith.mulf %14, %16 : vector<16x384xf32>
    %18 = vector.extract_strided_slice %2 {offsets = [1, 0], sizes = [1, 384], strides = [1, 1]} : vector<2x384xf32> to vector<1x384xf32>
    %19 = vector.broadcast %18 : vector<1x384xf32> to vector<16x384xf32>
    %20 = arith.addf %17, %19 : vector<16x384xf32>
    %c0_9 = arith.constant 0 : index
    %c0_10 = arith.constant 0 : index
    %21 = vector.load %arg4[%c0_9, %c0_10] : memref<16x384xf32, #tpu.memory_space<vmem>>, vector<16x384xf32>
    tpu.vector_store %arg4[%c0_9, %c0_10], %20 {strides = array<i32>} : memref<16x384xf32, #tpu.memory_space<vmem>>, vector<16x384xf32>,
    return
  }
  func.func @transform_0(%arg0: i32) -> (i32, i32) {
    %c0_i32 = arith.constant 0 : i32
    %c0_i32_0 = arith.constant 0 : i32
    return %arg0, %c0_i32 : i32, i32
  }
  func.func @transform_1(%arg0: i32) -> (i32, i32) {
    %c0_i32 = arith.constant 0 : i32
    %c0_i32_0 = arith.constant 0 : i32
    %c0_i32_1 = arith.constant 0 : i32
    return %c0_i32, %c0_i32_0 : i32, i32
  }
  func.func @transform_2(%arg0: i32) -> (i32, i32) {
    %c0_i32 = arith.constant 0 : i32
    %c0_i32_0 = arith.constant 0 : i32
    %c0_i32_1 = arith.constant 0 : i32
    return %c0_i32, %c0_i32_0 : i32, i32
  }
  func.func @transform_3(%arg0: i32) -> (i32, i32) {
    %c0_i32 = arith.constant 0 : i32
    %c0_i32_0 = arith.constant 0 : i32
    return %arg0, %c0_i32 : i32, i32
  }
}

</mosaic_0001>

<bundles_post_ra>
// kernel: tpu_custom_call.1
= control target key start
LH: loop header
LB: loop body
LE: loop exit
PB: predicated region body
PF: predicated region fallthrough
CT: control target
= control target key end

     0   :  { %8 = vsyncpa [#allocation3], 0  ;;  %s1679_s0 = inlined_call_operand.hbm [shape: f32[16,384], index: 0, kind: input, shape index: {}]   ;;  %s1680_s1 = inlined_call_operand.hbm [shape: f32[2,384], index: 1, kind: input, shape index: {}]   ;;  %s1681_s2 = inlined_call_operand.hbm [shape: f32[384,384], index: 2, kind: input, shape index: {}]   ;;  %s1682_s3 = inlined_call_operand.hbm [shape: f32[16,384], index: 3, kind: output, shape index: {}]  }
   0x1   :  { %9 = vsyncpa [#allocation6], 0  ;;  %s29_s14 = sshll.u32 %s1680_s1, 4  ;;  %s30_s14 = int_to_ptr.hbm [resolvable:$true] %s29_s14 }
   0x2   :  { %10 = vsyncpa [#allocation4], 0  ;;  %s930_s15 = smov [#allocation5]   ;;  %s15_s19 = sshll.u32 %s1679_s0, 4  ;;  %s16_s19 = int_to_ptr.hbm [resolvable:$true] %s15_s19 }
   0x3   :  { %s31_s16 = sshll.u32 %s930_s15, 4  ;;  %s931_s20 = smov [#allocation2]   ;;  %s32_s16 = int_to_ptr.vmem [resolvable:$true] %s31_s16 }
   0x4   :  { %34 = dma.hbm_to_vmem [thread:$0]  %s30_s14, 96, %s32_s16, [#allocation6]  }
   0x5   :  { %s17_s21 = sshll.u32 %s931_s20, 4  ;;  %s932_s22 = smov 384   ;;  %s18_s21 = int_to_ptr.vmem [resolvable:$true] %s17_s21 }
   0x6   :  { %s933_s23 = smov 24   ;;  %s39_s25 = sshll.u32 %s1681_s2, 4  ;;  %s40_s25 = int_to_ptr.hbm [resolvable:$true] %s39_s25 }
   0x7   :  { %23 = dma.hbm_to_vmem [thread:$0]  %s16_s19, 768, %s18_s21, [#allocation3], %s932_s22, %s932_s22, %s933_s23  }
   0x8   :  { %s934_s26 = smov [#allocation7]  }
   0x9   :  { %s41_s27 = sshll.u32 %s934_s26, 4  ;;  %s42_s27 = int_to_ptr.vmem [resolvable:$true] %s41_s27 }
   0xa   :  { %47 = dma.hbm_to_vmem [thread:$0]  %s40_s25, 18432, %s42_s27, [#allocation6], %s932_s22, %s932_s22, %s933_s23  }
   0xb   :  { %924 = dma.done.wait [#allocation3], 768  }
   0xc   :  { %925 = vsyncadd [#allocation3], 4294966528 }
   0xd   :  { %926 = dma.done.wait [#allocation6], 18528  }
   0xe   :  { %927 = vsyncadd [#allocation6], 4294948768  ;;  %v971_v0 = vld [vmem:[#allocation7 + $0x168] sm:$0xff]  ;;  %v973_v1 = vld [vmem:[#allocation7 + $0x150] sm:$0xff]  ;;  %s935_s0 = smov [#allocation8]   ;;  %s764_s30 = sshll.u32 %s1682_s3, 4  ;;  %s765_s30 = int_to_ptr.hbm [resolvable:$true] %s764_s30 }
   0xf   :  { %v975_v2 = vld [vmem:[#allocation7 + $0x2e8] sm:$0xff]  ;;  %211 = vmatpush.msra.mxu0 %v971_v0  ;;  %v979_v3 = vld [vmem:[#allocation7 + $0x2d0] sm:$0xff]  ;;  %v981_v4 = vld [vmem:[#allocation7 + $0x138] sm:$0xff]  ;;  %s762_s2 = sshll.u32 %s935_s0, 4  ;;  %s763_s2 = int_to_ptr.vmem [resolvable:$true] %s762_s2 }
  0x10   :  { %234 = vmatpush.msra.mxu1 %v975_v2  ;;  %v983_v5 = vld [vmem:[#allocation7 + $0x2b8] sm:$0xff]  ;;  %v987_v6 = vld [vmem:[#allocation7 + $0x468] sm:$0xff]  ;;  %v989_v7 = vld [vmem:[#allocation7 + $0x120] sm:$0xff] }
  0x11   :  { %212 = vmatpush.msra.mxu0 %v973_v1  ;;  %v991_v8 = vld [vmem:[#allocation7 + $0x2a0] sm:$0xff]  ;;  %257 = vmatpush.msra.mxu2 %v987_v6  ;;  %v994_v9 = vld [vmem:[#allocation7 + $0x450] sm:$0xff]  ;;  %v998_v10 = vld [vmem:[#allocation7 + $0x438] sm:$0xff] }
  0x12   :  { %235 = vmatpush.msra.mxu1 %v979_v3  ;;  %v1000_v11 = vld [vmem:[#allocation7 + $0x108] sm:$0xff]  ;;  %v1007_v13 = vld [vmem:[#allocation7 + $0x420] sm:$0xff]  ;;  %v1009_v14 = vld [vmem:[#allocation7 + $0xf0] sm:$0xff] }
  0x13   :  { %213 = vmatpush.msra.mxu0 %v981_v4  ;;  %v1002_v12 = vld [vmem:[#allocation7 + $0x288] sm:$0xff]  ;;  %258 = vmatpush.msra.mxu2 %v994_v9  ;;  %v1011_v15 = vld [vmem:[#allocation7 + $0x270] sm:$0xff]  ;;  %v1018_v17 = vld [vmem:[#allocation7 + $0xd8] sm:$0xff] }
  0x14   :  { %236 = vmatpush.msra.mxu1 %v983_v5  ;;  %v1016_v16 = vld [vmem:[#allocation7 + $0x408] sm:$0xff]  ;;  %v1020_v18 = vld [vmem:[#allocation7 + $0x258] sm:$0xff]  ;;  %v1023_v19 = vld [vmem:[#allocation7 + $0x170] sm:$0xff] }
  0x15   :  { %214 = vmatpush.msra.mxu0 %v989_v7  ;;  %259 = vmatpush.msra.mxu2 %v998_v10  ;;  %v1027_v20 = vld [vmem:[#allocation7 + $0x3f0] sm:$0xff]  ;;  %v1029_v21 = vld [vmem:[#allocation7 + $0x158] sm:$0xff]  ;;  %v1031_v22 = vld [vmem:[#allocation7 + $0xc0] sm:$0xff] }
  0x16   :  { %237 = vmatpush.msra.mxu1 %v991_v8  ;;  %v1033_v23 = vld [vmem:[#allocation7 + $0x240] sm:$0xff]  ;;  %280 = vmatpush.msra.mxu3 %v1023_v19  ;;  %v1039_v24 = vld [vmem:[#allocation7 + $0x3d8] sm:$0xff]  ;;  %v1043_v26 = vld [vmem:[#allocation7 + $0xa8] sm:$0xff] }
  0x17   :  { %215 = vmatpush.msra.mxu0 %v1000_v11  ;;  %260 = vmatpush.msra.mxu2 %v1007_v13  ;;  %v1041_v25 = vld [vmem:[#allocation7 + $0x140] sm:$0xff]  ;;  %v1045_v27 = vld [vmem:[#allocation7 + $0x228] sm:$0xff]  ;;  %v1055_v30 = vld [vmem:[#allocation7 + $0x90] sm:$0xff] }
  0x18   :  { %238 = vmatpush.msra.mxu1 %v1002_v12  ;;  %281 = vmatpush.msra.mxu3 %v1029_v21  ;;  %v1051_v28 = vld [vmem:[#allocation7 + $0x3c0] sm:$0xff]  ;;  %v1053_v29 = vld [vmem:[#allocation7 + $0x128] sm:$0xff]  ;;  %v1057_v31 = vld [vmem:[#allocation7 + $0x210] sm:$0xff] }
  0x19   :  { %216 = vmatpush.msra.mxu0 %v1009_v14  ;;  %261 = vmatpush.msra.mxu2 %v1016_v16  ;;  %1772 = vst [vmem:[#allocation12_spill] sm:$0xff] %v1051_v28  ;;  %v1063_v32 = vld [vmem:[#allocation7 + $0x3a8] sm:$0xff]  ;;  %v1065_v33 = vld [vmem:[#allocation7 + $0x110] sm:$0xff]  ;;  %v1067_v34 = vld [vmem:[#allocation7 + $0x78] sm:$0xff] }
  0x1a   :  { %239 = vmatpush.msra.mxu1 %v1011_v15  ;;  %282 = vmatpush.msra.mxu3 %v1041_v25  ;;  %1773 = vst [vmem:[#allocation13_spill] sm:$0xff] %v1063_v32  ;;  %v1069_v35 = vld [vmem:[#allocation7 + $0x1f8] sm:$0xff]  ;;  %v1075_v36 = vld [vmem:[#allocation7 + $0x390] sm:$0xff]  ;;  %v1079_v38 = vld [vmem:[#allocation7 + $0x60] sm:$0xff] }
  0x1b   :  { %217 = vmatpush.msra.mxu0 %v1018_v17  ;;  %262 = vmatpush.msra.mxu2 %v1027_v20  ;;  %1774 = vst [vmem:[#allocation14_spill] sm:$0xff] %v1075_v36  ;;  %v1077_v37 = vld [vmem:[#allocation7 + $0xf8] sm:$0xff]  ;;  %v1081_v39 = vld [vmem:[#allocation7 + $0x1e0] sm:$0xff]  ;;  %v1091_v42 = vld [vmem:[#allocation7 + $0x48] sm:$0xff] }
  0x1c   :  { %240 = vmatpush.msra.mxu1 %v1020_v18  ;;  %283 = vmatpush.msra.mxu3 %v1053_v29  ;;  %v1087_v40 = vld [vmem:[#allocation7 + $0x378] sm:$0xff]  ;;  %v1089_v41 = vld [vmem:[#allocation7 + $0xe0] sm:$0xff]  ;;  %v1093_v43 = vld [vmem:[#allocation7 + $0x1c8] sm:$0xff] }
  0x1d   :  { %218 = vmatpush.msra.mxu0 %v1031_v22  ;;  %263 = vmatpush.msra.mxu2 %v1039_v24  ;;  %1775 = vst [vmem:[#allocation15_spill] sm:$0xff] %v1087_v40  ;;  %v1099_v44 = vld [vmem:[#allocation7 + $0x360] sm:$0xff]  ;;  %v1101_v45 = vld [vmem:[#allocation7 + $0xc8] sm:$0xff]  ;;  %v1103_v46 = vld [vmem:[#allocation7 + $0x30] sm:$0xff] }
  0x1e   :  { %241 = vmatpush.msra.mxu1 %v1033_v23  ;;  %284 = vmatpush.msra.mxu3 %v1065_v33  ;;  %1776 = vst [vmem:[#allocation16_spill] sm:$0xff] %v1089_v41  ;;  %v1105_v47 = vld [vmem:[#allocation7 + $0x1b0] sm:$0xff]  ;;  %v1111_v48 = vld [vmem:[#allocation7 + $0x348] sm:$0xff]  ;;  %v1115_v50 = vld [vmem:[#allocation7 + $0x18] sm:$0xff] }
  0x1f   :  { %219 = vmatpush.msra.mxu0 %v1043_v26  ;;  %264 = vmatpush.msra.mxu2 %v1051_v28  ;;  %1777 = vst [vmem:[#allocation17_spill] sm:$0xff] %v1093_v43  ;;  %v1113_v49 = vld [vmem:[#allocation7 + $0xb0] sm:$0xff]  ;;  %v1117_v51 = vld [vmem:[#allocation7 + $0x198] sm:$0xff]  ;;  %v1127_v54 = vld [vmem:[#allocation7] sm:$0xff] }
  0x20   :  { %242 = vmatpush.msra.mxu1 %v1045_v27  ;;  %285 = vmatpush.msra.mxu3 %v1077_v37  ;;  %1778 = vst [vmem:[#allocation18_spill] sm:$0xff] %v1099_v44  ;;  %v1123_v52 = vld [vmem:[#allocation7 + $0x330] sm:$0xff]  ;;  %v1125_v53 = vld [vmem:[#allocation7 + $0x98] sm:$0xff]  ;;  %v1129_v55 = vld [vmem:[#allocation7 + $0x180] sm:$0xff] }
  0x21   :  { %220 = vmatpush.msra.mxu0 %v1055_v30  ;;  %265 = vmatpush.msra.mxu2 %v1063_v32  ;;  %1779 = vst [vmem:[#allocation19_spill] sm:$0xff] %v1101_v45  ;;  %v1135_v56 = vld [vmem:[#allocation7 + $0x2f0] sm:$0xff]  ;;  %v1140_v58 = vld [vmem:[#allocation7 + $0x318] sm:$0xff]  ;;  %v1143_v59 = vld [vmem:[#allocation7 + $0x80] sm:$0xff] }
  0x22   :  { %243 = vmatpush.msra.mxu1 %v1057_v31  ;;  %1780 = vst [vmem:[#allocation20_spill] sm:$0xff] %v1105_v47  ;;  %286 = vmatpush.msra.mxu3 %v1089_v41  ;;  %v1137_v57 = vld [vmem:[#allocation7 + $0x470] sm:$0xff]  ;;  %v1147_v60 = vld [vmem:[#allocation7 + $0x2d8] sm:$0xff]  ;;  %v1153_v62 = vld [vmem:[#allocation7 + $0x300] sm:$0xff] }
  0x23   :  { %221 = vmatpush.msra.mxu0 %v1067_v34  ;;  %266 = vmatpush.msra.mxu2 %v1075_v36  ;;  %1781 = vst [vmem:[#allocation21_spill] sm:$0xff] %v1111_v48  ;;  %v1149_v61 = vld [vmem:[#allocation7 + $0x458] sm:$0xff]  ;;  %v1155_v63 = vld [vmem:[#allocation7 + $0x68] sm:$0xff]  ;;  %v1207_v32 = vld [vmem:[#allocation7 + $0x3e0] sm:$0xff] }
  0x24   :  { %244 = vmatpush.msra.mxu1 %v1069_v35  ;;  %1782 = vst [vmem:[#allocation22_spill] sm:$0xff] %v1113_v49  ;;  %287 = vmatpush.msra.mxu3 %v1101_v45  ;;  %v1195_v36 = vld [vmem:[#allocation7 + $0x3f8] sm:$0xff]  ;;  %v1219_v45 = vld [vmem:[#allocation7 + $0x3c8] sm:$0xff]  ;;  %v1231_v28 = vld [vmem:[#allocation7 + $0x3b0] sm:$0xff] }
  0x25   :  { %222 = vmatpush.msra.mxu0 %v1079_v38  ;;  %267 = vmatpush.msra.mxu2 %v1087_v40  ;;  %1783 = vst [vmem:[#allocation23_spill] sm:$0xff] %v1117_v51  ;;  %v1167_v40 = vld [vmem:[#allocation2] sm:$0xff]  ;;  %v1290_v41 = vld [vmem:[#allocation7 + $0x338] sm:$0xff] }
  0x26   :  { %245 = vmatpush.msra.mxu1 %v1081_v39  ;;  %1784 = vst [vmem:[#allocation24_spill] sm:$0xff] %v1123_v52  ;;  %288 = vmatpush.msra.mxu3 %v1113_v49  ;;  %v1203_v49 = vld [vmem:[#allocation7 + $0x160] sm:$0xff] }
  0x27   :  { %223 = vmatpush.msra.mxu0 %v1091_v42  ;;  %268 = vmatpush.msra.mxu2 %v1099_v44  ;;  %1785 = vst [vmem:[#allocation25_spill] sm:$0xff] %v1125_v53  ;;  %v1165_v44 = vld [vmem:[#allocation2 + $0x10] sm:$0xff] }
  0x28   :  { %246 = vmatpush.msra.mxu1 %v1093_v43  ;;  %1786 = vst [vmem:[#allocation26_spill] sm:$0xff] %v1129_v55  ;;  %289 = vmatpush.msra.mxu3 %v1125_v53  ;;  %v1183_v53 = vld [vmem:[#allocation7 + $0x410] sm:$0xff]  ;;  %v1261_v43 = vld [vmem:[#allocation7 + $0x118] sm:$0xff] }
  0x29   :  { %224 = vmatpush.msra.mxu0 %v1103_v46  ;;  %269 = vmatpush.msra.mxu2 %v1111_v48  ;;  %1787 = vst [vmem:[#allocation27_spill] sm:$0xff] %v1137_v57  ;;  %v1159_v48 = vld [vmem:[#allocation7 + $0x440] sm:$0xff] }
  0x2a   :  { %247 = vmatpush.msra.mxu1 %v1105_v47  ;;  %1788 = vst [vmem:[#allocation28_spill] sm:$0xff] %v1140_v58  ;;  %290 = vmatpush.msra.mxu3 %v1143_v59  ;;  %v1215_v47 = vld [vmem:[#allocation7 + $0x8] sm:$0xff] }
  0x2b   :  { %225 = vmatpush.msra.mxu0 %v1115_v50  ;;  %270 = vmatpush.msra.mxu2 %v1123_v52  ;;  %1789 = vst [vmem:[#allocation29_spill] sm:$0xff] %v1143_v59  ;;  %v1157_v52 = vld [vmem:[#allocation7 + $0x2c0] sm:$0xff]  ;;  %v1179_v59 = vld [vmem:[#allocation7 + $0x50] sm:$0xff] }
  0x2c   :  { %248 = vmatpush.msra.mxu1 %v1117_v51  ;;  %1790 = vst [vmem:[#allocation30_spill] sm:$0xff] %v1149_v61  ;;  %291 = vmatpush.msra.mxu3 %v1155_v63  ;;  %v1201_v51 = vld [vmem:[#allocation7 + $0x20] sm:$0xff] }
  0x2d   :  { %226 = vmatpush.msra.mxu0 %v1127_v54  ;;  %1791 = vst [vmem:[#allocation31_spill] sm:$0xff] %v1153_v62  ;;  %271 = vmatpush.msra.mxu2 %v1140_v58  ;;  %v1177_v58 = vld [vmem:[#allocation2 + $0x8] sm:$0xff] }
  0x2e   :  { %249 = vmatpush.msra.mxu1 %v1129_v55  ;;  %1792 = vst [vmem:[#allocation32_spill] sm:$0xff] %v1155_v63  ;;  %v1171_v55 = vld [vmem:[#allocation7 + $0x428] sm:$0xff]  ;;  %227 = vmatmul.f32.vlgmr.msra.gmra.mxu0 %v1167_v40  ;;  %v1191_v63 = vld [vmem:[#allocation7 + $0x178] sm:$0xff] }
  0x2f   :  { %303 = vmatpush.msrb.mxu0 %v1135_v56  ;;  %1793 = vst [vmem:[#allocation33_spill] sm:$0xff] %v1159_v48  ;;  %272 = vmatpush.msra.mxu2 %v1153_v62  ;;  %v1189_v62 = vld [vmem:[#allocation7 + $0x38] sm:$0xff] }
  0x30   :  { %326 = vmatpush.msrb.mxu1 %v1137_v57  ;;  %v1169_v57 = vld [vmem:[#allocation7 + $0x2a8] sm:$0xff]  ;;  %1794 = vst [vmem:[#allocation34_spill] sm:$0xff] %v1171_v55  ;;  %273 = vmatmul.f32.vlgmr.msra.gmra.mxu2 %v1165_v44 }
  0x31   :  { %304 = vmatpush.msrb.mxu0 %v1147_v60  ;;  %1795 = vst [vmem:[#allocation35_spill] sm:$0xff] %v1179_v59  ;;  %250 = vmatmul.f32.vlgmr.msra.gmra.mxu1 %v1177_v58 }
  0x32   :  { %327 = vmatpush.msrb.mxu1 %v1149_v61  ;;  %v1181_v61 = vld [vmem:[#allocation7 + $0x290] sm:$0xff]  ;;  %1796 = vst [vmem:[#allocation36_spill] sm:$0xff] %v1183_v53  ;;  %292 = vmatpush.msra.mxu3 %v1179_v59 }
  0x33   :  { %305 = vmatpush.msrb.mxu0 %v1157_v52  ;;  %1797 = vst [vmem:[#allocation37_spill] sm:$0xff] %v1189_v62  ;;  %349 = vmatpush.msrb.mxu2 %v1191_v63  ;;  %v1213_v59 = vld [vmem:[#allocation2 + $0x28] sm:$0xff] }
  0x34   :  { %328 = vmatpush.msrb.mxu1 %v1159_v48  ;;  %1798 = vst [vmem:[#allocation38_spill] sm:$0xff] %v1191_v63  ;;  %v1193_v48 = vld [vmem:[#allocation7 + $0x278] sm:$0xff]  ;;  %293 = vmatpush.msra.mxu3 %v1189_v62  ;;  %v1225_v63 = vld [vmem:[#allocation2 + $0x18] sm:$0xff]  ;;  %v1227_v62 = vld [vmem:[#allocation2 + $0x20] sm:$0xff] }
  0x35   :  { %306 = vmatpush.msrb.mxu0 %v1169_v57  ;;  %1799 = vst [vmem:[#allocation39_spill] sm:$0xff] %v1193_v48  ;;  %350 = vmatpush.msrb.mxu2 %v1203_v49 }
  0x36   :  { %329 = vmatpush.msrb.mxu1 %v1171_v55  ;;  %1800 = vst [vmem:[#allocation40_spill] sm:$0xff] %v1195_v36  ;;  %v1205_v55 = vld [vmem:[#allocation7 + $0x260] sm:$0xff]  ;;  %294 = vmatpush.msra.mxu3 %v1201_v51 }
  0x37   :  { %307 = vmatpush.msrb.mxu0 %v1181_v61  ;;  %1801 = vst [vmem:[#allocation41_spill] sm:$0xff] %v1201_v51  ;;  %v1239_v51 = vld [vmem:[#allocation7 + $0x148] sm:$0xff] }
  0x38   :  { %330 = vmatpush.msrb.mxu1 %v1183_v53  ;;  %1802 = vst [vmem:[#allocation42_spill] sm:$0xff] %v1203_v49  ;;  %v1217_v53 = vld [vmem:[#allocation7 + $0x248] sm:$0xff]  ;;  %276 = vmatmul.f32.gmra.mxu2 %v1213_v59  ;;  %v1237_v49 = vld [vmem:[#allocation7 + $0x2f8] sm:$0xff] }
  0x39   :  { %1803 = vst [vmem:[#allocation43_spill] sm:$0xff] %v1205_v55  ;;  %308 = vmatpush.msrb.mxu0 %v1193_v48  ;;  %295 = vmatpush.msra.mxu3 %v1215_v47  ;;  %v1259_v48 = vld [vmem:[#allocation7 + $0x2e0] sm:$0xff] }
  0x3a   :  { %1804 = vst [vmem:[#allocation44_spill] sm:$0xff] %v1207_v32  ;;  %331 = vmatpush.msrb.mxu1 %v1195_v36  ;;  %v1229_v36 = vld [vmem:[#allocation7 + $0x230] sm:$0xff]  ;;  %230 = vmatmul.f32.gmra.mxu0 %v1225_v63 }
  0x3b   :  { %1805 = vst [vmem:[#allocation45_spill] sm:$0xff] %v1215_v47  ;;  %309 = vmatpush.msrb.mxu0 %v1205_v55  ;;  %v1243_v55 = vld [vmem:[#allocation7 + $0x398] sm:$0xff]  ;;  %253 = vmatmul.f32.gmra.mxu1 %v1227_v62  ;;  %v1249_v47 = vld [vmem:[#allocation7 + $0x130] sm:$0xff] }
  0x3c   :  { %1806 = vst [vmem:[#allocation46_spill] sm:$0xff] %v1217_v53  ;;  %332 = vmatpush.msrb.mxu1 %v1207_v32  ;;  %v1241_v32 = vld [vmem:[#allocation7 + $0x218] sm:$0xff]  ;;  %372 = vmatpush.msrb.mxu3 %v1237_v49 }
  0x3d   :  { %1807 = vst [vmem:[#allocation47_spill] sm:$0xff] %v1219_v45  ;;  %310 = vmatpush.msrb.mxu0 %v1217_v53  ;;  %v1251_v53 = vld [vmem:[#allocation7 + $0x200] sm:$0xff]  ;;  %351 = vmatpush.msrb.mxu2 %v1239_v51 }
  0x3e   :  { %1808 = vst [vmem:[#allocation48_spill] sm:$0xff] %v1229_v36  ;;  %333 = vmatpush.msrb.mxu1 %v1219_v45  ;;  %v1253_v45 = vld [vmem:[#allocation7 + $0x380] sm:$0xff]  ;;  %296 = vmatmul.f32.vlgmr.msra.gmra.mxu3 %v1167_v40 }
  0x3f   :  { %1809 = vst [vmem:[#allocation49_spill] sm:$0xff] %v1231_v28  ;;  %311 = vmatpush.msrb.mxu0 %v1229_v36  ;;  %v1263_v36 = vld [vmem:[#allocation7 + $0x1e8] sm:$0xff]  ;;  %352 = vmatpush.msrb.mxu2 %v1249_v47 }
  0x40   :  { %1810 = vst [vmem:[#allocation50_spill] sm:$0xff] %v1237_v49  ;;  %334 = vmatpush.msrb.mxu1 %v1231_v28  ;;  %v1265_v28 = vld [vmem:[#allocation7 + $0x368] sm:$0xff]  ;;  %v1273_v49 = vld [vmem:[#allocation7 + $0x100] sm:$0xff]  ;;  %373 = vmatpush.msrb.mxu3 %v1259_v48 }
  0x41   :  { %1811 = vst [vmem:[#allocation51_spill] sm:$0xff] %v1239_v51  ;;  %312 = vmatpush.msrb.mxu0 %v1241_v32  ;;  %v1271_v51 = vld [vmem:[#allocation7 + $0x2c8] sm:$0xff]  ;;  %353 = vmatpush.msrb.mxu2 %v1261_v43 }
  0x42   :  { %1812 = vst [vmem:[#allocation52_spill] sm:$0xff] %v1241_v32  ;;  %335 = vmatpush.msrb.mxu1 %v1243_v55  ;;  %v1278_v32 = vld [vmem:[#allocation7 + $0x350] sm:$0xff]  ;;  %374 = vmatpush.msrb.mxu3 %v1271_v51 }
  0x43   :  { %1813 = vst [vmem:[#allocation53_spill] sm:$0xff] %v1243_v55  ;;  %313 = vmatpush.msrb.mxu0 %v1251_v53  ;;  %v1275_v55 = vld [vmem:[#allocation7 + $0x1d0] sm:$0xff]  ;;  %354 = vmatpush.msrb.mxu2 %v1273_v49 }
  0x44   :  { %1814 = vst [vmem:[#allocation54_spill] sm:$0xff] %v1249_v47  ;;  %336 = vmatpush.msrb.mxu1 %v1253_v45  ;;  %v1283_v47 = vld [vmem:[#allocation7 + $0x2b0] sm:$0xff] }
  0x45   :  { %1815 = vst [vmem:[#allocation55_spill] sm:$0xff] %v1251_v53  ;;  %314 = vmatpush.msrb.mxu0 %v1263_v36  ;;  %v1285_v53 = vld [vmem:[#allocation7 + $0xe8] sm:$0xff]  ;;  %375 = vmatpush.msrb.mxu3 %v1283_v47 }
  0x46   :  { %1816 = vst [vmem:[#allocation56_spill] sm:$0xff] %v1253_v45  ;;  %337 = vmatpush.msrb.mxu1 %v1265_v28  ;;  %v1287_v45 = vld [vmem:[#allocation7 + $0x1b8] sm:$0xff]  ;;  %355 = vmatpush.msrb.mxu2 %v1285_v53 }
  0x47   :  { %1817 = vst [vmem:[#allocation57_spill] sm:$0xff] %v1259_v48  ;;  %315 = vmatpush.msrb.mxu0 %v1275_v55  ;;  %v1297_v48 = vld [vmem:[#allocation7 + $0xd0] sm:$0xff]  ;;  %299 = vmatmul.f32.gmra.mxu3 %v1225_v63 }
  0x48   :  { %1818 = vst [vmem:[#allocation58_spill] sm:$0xff] %v1261_v43  ;;  %338 = vmatpush.msrb.mxu1 %v1278_v32  ;;  %v1295_v43 = vld [vmem:[#allocation7 + $0x298] sm:$0xff]  ;;  %356 = vmatpush.msrb.mxu2 %v1297_v48 }
  0x49   :  { %1819 = vst [vmem:[#allocation59_spill] sm:$0xff] %v1263_v36  ;;  %v1302_v36 = vld [vmem:[#allocation7 + $0x320] sm:$0xff]  ;;  %316 = vmatpush.msrb.mxu0 %v1287_v45  ;;  %376 = vmatpush.msrb.mxu3 %v1295_v43 }
  0x4a   :  { %1820 = vst [vmem:[#allocation60_spill] sm:$0xff] %v1265_v28  ;;  %v1299_v28 = vld [vmem:[#allocation7 + $0x1a0] sm:$0xff]  ;;  %339 = vmatpush.msrb.mxu1 %v1290_v41 }
  0x4b   :  { %1821 = vst [vmem:[#allocation61_spill] sm:$0xff] %v1271_v51  ;;  %v1309_v51 = vld [vmem:[#allocation7 + $0x188] sm:$0xff]  ;;  %317 = vmatpush.msrb.mxu0 %v1299_v28 }
  0x4c   :  { %1822 = vst [vmem:[#allocation62_spill] sm:$0xff] %v1273_v49  ;;  %v1307_v49 = vld [vmem:[#allocation7 + $0xb8] sm:$0xff]  ;;  %340 = vmatpush.msrb.mxu1 %v1302_v36 }
  0x4d   :  { %1823 = vst [vmem:[#allocation63_spill] sm:$0xff] %v1278_v32  ;;  %v1312_v32 = vld [vmem:[#allocation7 + $0x308] sm:$0xff]  ;;  %357 = vmatpush.msrb.mxu2 %v1307_v49  ;;  %318 = vmatpush.msrb.mxu0 %v1309_v51 }
  0x4e   :  { %1824 = vst [vmem:[#allocation64_spill] sm:$0xff] %v1283_v47  ;;  %v1317_v47 = vld [vmem:[#allocation7 + $0x478] sm:$0xff]  ;;  %341 = vmatpush.msrb.mxu1 %v1312_v32  ;;  %319 = vmatmul.f32.vlgmr.msrb.gmra.mxu0 %v1177_v58 }
  0x4f   :  { %1825 = vst [vmem:[#allocation65_spill] sm:$0xff] %v1285_v53  ;;  %v1320_v53 = vld [vmem:[#allocation7 + $0x280] sm:$0xff]  ;;  %342 = vmatmul.f32.vlgmr.msrb.gmra.mxu1 %v1165_v44  ;;  %395 = vmatpush.msra.mxu0 %v1317_v47 }
  0x50   :  { %1826 = vst [vmem:[#allocation66_spill] sm:$0xff] %v1290_v41  ;;  %v1325_v41 = vld [vmem:[#allocation7 + $0xa0] sm:$0xff]  ;;  %377 = vmatpush.msrb.mxu3 %v1320_v53  ;;  %436 = vmatpush.msra.mxu1 %v971_v0 }
  0x51   :  { %1827 = vst [vmem:[#allocation67_spill] sm:$0xff] %v1295_v43  ;;  %v1335_v43 = vld [vmem:[#allocation7 + $0x88] sm:$0xff]  ;;  %358 = vmatpush.msrb.mxu2 %v1325_v41  ;;  %v1357_v0 = vld [vmem:[#allocation7 + $0x220] sm:$0xff] }
  0x52   :  { %1828 = vst [vmem:[#allocation68_spill] sm:$0xff] %v1297_v48  ;;  %v1329_v48 = vld [vmem:[#allocation7 + $0x460] sm:$0xff]  ;;  %437 = vmatpush.msra.mxu1 %v973_v1 }
  0x53   :  { %1829 = vst [vmem:[#allocation69_spill] sm:$0xff] %v1299_v28  ;;  %396 = vmatpush.msra.mxu0 %v1329_v48  ;;  %v1347_v28 = vld [vmem:[#allocation7 + $0x430] sm:$0xff]  ;;  %359 = vmatpush.msrb.mxu2 %v1335_v43  ;;  %v1367_v1 = vld [vmem:[#allocation7 + $0x400] sm:$0xff] }
  0x54   :  { %1830 = vst [vmem:[#allocation70_spill] sm:$0xff] %v1302_v36  ;;  %v1331_v36 = vld [vmem:[#allocation7 + $0x268] sm:$0xff]  ;;  %438 = vmatpush.msra.mxu1 %v981_v4 }
  0x55   :  { %1831 = vst [vmem:[#allocation71_spill] sm:$0xff] %v1307_v49  ;;  %v1337_v49 = vld [vmem:[#allocation7 + $0x448] sm:$0xff]  ;;  %378 = vmatpush.msrb.mxu3 %v1331_v36 }
  0x56   :  { %1832 = vst [vmem:[#allocation72_spill] sm:$0xff] %v1309_v51  ;;  %v1339_v51 = vld [vmem:[#allocation7 + $0x250] sm:$0xff]  ;;  %397 = vmatpush.msra.mxu0 %v1337_v49  ;;  %v1375_v4 = vld [vmem:[#allocation7 + $0x3e8] sm:$0xff]  ;;  %439 = vmatpush.msra.mxu1 %v989_v7  ;;  %v1395_v7 = vld [vmem:[#allocation7 + $0x3b8] sm:$0xff] }
  0x57   :  { %1833 = vst [vmem:[#allocation73_spill] sm:$0xff] %v1312_v32  ;;  %v1345_v32 = vld [vmem:[#allocation7 + $0x70] sm:$0xff]  ;;  %379 = vmatpush.msrb.mxu3 %v1339_v51  ;;  %322 = vmatmul.f32.gmra.mxu0 %v1227_v62 }
  0x58   :  { %1834 = vst [vmem:[#allocation74_spill] sm:$0xff] %v1317_v47  ;;  %v1349_v47 = vld [vmem:[#allocation7 + $0x238] sm:$0xff]  ;;  %360 = vmatpush.msrb.mxu2 %v1345_v32  ;;  %398 = vmatpush.msra.mxu0 %v1347_v28 }
  0x59   :  { %1835 = vst [vmem:[#allocation75_spill] sm:$0xff] %v1325_v41  ;;  %v1355_v41 = vld [vmem:[#allocation7 + $0x418] sm:$0xff]  ;;  %380 = vmatpush.msrb.mxu3 %v1349_v47  ;;  %345 = vmatmul.f32.gmra.mxu1 %v1213_v59 }
  0x5a   :  { %1836 = vst [vmem:[#allocation76_spill] sm:$0xff] %v1329_v48  ;;  %v1363_v48 = vld [vmem:[#allocation7 + $0x58] sm:$0xff]  ;;  %399 = vmatpush.msra.mxu0 %v1355_v41  ;;  %440 = vmatpush.msra.mxu1 %v1000_v11  ;;  %v1405_v11 = vld [vmem:[#allocation7 + $0x1a8] sm:$0xff] }
  0x5b   :  { %1837 = vst [vmem:[#allocation77_spill] sm:$0xff] %v1335_v43  ;;  %381 = vmatpush.msrb.mxu3 %v1357_v0  ;;  %361 = vmatpush.msrb.mxu2 %v1363_v48  ;;  %v1383_v43 = vld [vmem:[#allocation7 + $0x28] sm:$0xff] }
  0x5c   :  { %1838 = vst [vmem:[#allocation78_spill] sm:$0xff] %v1337_v49  ;;  %v1369_v49 = vld [vmem:[#allocation7 + $0x208] sm:$0xff]  ;;  %400 = vmatpush.msra.mxu0 %v1367_v1  ;;  %441 = vmatpush.msra.mxu1 %v1009_v14  ;;  %v1419_v14 = vld [vmem:[#allocation7 + $0x370] sm:$0xff] }
  0x5d   :  { %1839 = vst [vmem:[#allocation79_spill] sm:$0xff] %v1345_v32  ;;  %v1373_v32 = vld [vmem:[#allocation7 + $0x40] sm:$0xff]  ;;  %382 = vmatpush.msrb.mxu3 %v1369_v49 }
  0x5e   :  { %1840 = vst [vmem:[#allocation80_spill] sm:$0xff] %v1347_v28  ;;  %v1377_v28 = vld [vmem:[#allocation7 + $0x1f0] sm:$0xff]  ;;  %362 = vmatpush.msrb.mxu2 %v1373_v32  ;;  %401 = vmatpush.msra.mxu0 %v1375_v4 }
  0x5f   :  { %1841 = vst [vmem:[#allocation81_spill] sm:$0xff] %v1349_v47  ;;  %v1385_v47 = vld [vmem:[#allocation7 + $0x3d0] sm:$0xff]  ;;  %383 = vmatpush.msrb.mxu3 %v1377_v28  ;;  %442 = vmatpush.msra.mxu1 %v1018_v17  ;;  %v1426_v17 = vld [vmem:[#allocation7 + $0x358] sm:$0xff] }
  0x60   :  { %1842 = vst [vmem:[#allocation82_spill] sm:$0xff] %v1355_v41  ;;  %v1387_v41 = vld [vmem:[#allocation7 + $0x1d8] sm:$0xff]  ;;  %363 = vmatpush.msrb.mxu2 %v1383_v43  ;;  %402 = vmatpush.msra.mxu0 %v1385_v47 }
  0x61   :  { %1843 = vst [vmem:[#allocation83_spill] sm:$0xff] %v1363_v48  ;;  %v1393_v48 = vld [vmem:[#allocation7 + $0x10] sm:$0xff]  ;;  %384 = vmatpush.msrb.mxu3 %v1387_v41  ;;  %443 = vmatpush.msra.mxu1 %v1031_v22  ;;  %v1431_v22 = vld [vmem:[#allocation7 + $0x340] sm:$0xff] }
  0x62   :  { %1844 = vst [vmem:[#allocation84_spill] sm:$0xff] %v1367_v1  ;;  %v1397_v1 = vld [vmem:[#allocation7 + $0x1c0] sm:$0xff]  ;;  %364 = vmatpush.msrb.mxu2 %v1393_v48  ;;  %403 = vmatpush.msra.mxu0 %v1395_v7 }
  0x63   :  { %1845 = vst [vmem:[#allocation85_spill] sm:$0xff] %v1373_v32  ;;  %v1403_v32 = vld [vmem:[#allocation7 + $0x3a0] sm:$0xff]  ;;  %385 = vmatpush.msrb.mxu3 %v1397_v1  ;;  %365 = vmatmul.f32.vlgmr.msrb.gmra.mxu2 %v1167_v40 }
  0x64   :  { %1846 = vst [vmem:[#allocation86_spill] sm:$0xff] %v1375_v4  ;;  %v1411_v4 = vld [vmem:[#allocation7 + $0x388] sm:$0xff]  ;;  %404 = vmatpush.msra.mxu0 %v1403_v32  ;;  %444 = vmatpush.msra.mxu1 %v1043_v26  ;;  %v1864_v26 = vld [vmem:[#allocation29_spill] sm:$0xff] }
  0x65   :  { %1847 = vst [vmem:[#allocation87_spill] sm:$0xff] %v1383_v43  ;;  %v1413_v43 = vld [vmem:[#allocation7 + $0x190] sm:$0xff]  ;;  %386 = vmatpush.msrb.mxu3 %v1405_v11  ;;  %459 = vmatpush.msra.mxu2 %v975_v2  ;;  %v1437_v2 = vld [vmem:[#allocation7 + $0x328] sm:$0xff] }
  0x66   :  { %405 = vmatpush.msra.mxu0 %v1411_v4  ;;  %445 = vmatpush.msra.mxu1 %v1055_v30  ;;  %v1867_v30 = vld [vmem:[#allocation30_spill] sm:$0xff] }
  0x67   :  { %387 = vmatpush.msrb.mxu3 %v1413_v43  ;;  %460 = vmatpush.msra.mxu2 %v979_v3  ;;  %v1443_v3 = vld [vmem:[#allocation7 + $0x310] sm:$0xff] }
  0x68   :  { %388 = vmatmul.f32.vlgmr.msrb.gmra.mxu3 %v1177_v58  ;;  %406 = vmatpush.msra.mxu0 %v1419_v14 }
  0x69   :  { %446 = vmatpush.msra.mxu1 %v1067_v34  ;;  %482 = vmatpush.msra.mxu3 %v987_v6  ;;  %v1849_v6 = vld [vmem:[#allocation17_spill] sm:$0xff]  ;;  %v1870_v34 = vld [vmem:[#allocation55_spill] sm:$0xff] }
  0x6a   :  { %407 = vmatpush.msra.mxu0 %v1426_v17  ;;  %461 = vmatpush.msra.mxu2 %v983_v5  ;;  %v1848_v5 = vld [vmem:[#allocation16_spill] sm:$0xff] }
  0x6b   :  { %368 = vmatmul.f32.gmra.mxu2 %v1225_v63  ;;  %447 = vmatpush.msra.mxu1 %v1079_v38  ;;  %v1873_v38 = vld [vmem:[#allocation21_spill] sm:$0xff] }
  0x6c   :  { %408 = vmatpush.msra.mxu0 %v1431_v22  ;;  %462 = vmatpush.msra.mxu2 %v991_v8  ;;  %v1850_v8 = vld [vmem:[#allocation39_spill] sm:$0xff] }
  0x6d   :  { %448 = vmatpush.msra.mxu1 %v1091_v42  ;;  %483 = vmatpush.msra.mxu3 %v994_v9  ;;  %v1851_v9 = vld [vmem:[#allocation12_spill] sm:$0xff]  ;;  %v1875_v42 = vld [vmem:[#allocation34_spill] sm:$0xff] }
  0x6e   :  { %409 = vmatpush.msra.mxu0 %v1437_v2  ;;  %463 = vmatpush.msra.mxu2 %v1002_v12  ;;  %v1853_v12 = vld [vmem:[#allocation20_spill] sm:$0xff] }
  0x6f   :  { %449 = vmatpush.msra.mxu1 %v1103_v46  ;;  %484 = vmatpush.msra.mxu3 %v998_v10  ;;  %v1852_v10 = vld [vmem:[#allocation19_spill] sm:$0xff]  ;;  %v1876_v46 = vld [vmem:[#allocation37_spill] sm:$0xff] }
  0x70   :  { %391 = vmatmul.f32.gmra.mxu3 %v1227_v62  ;;  %410 = vmatpush.msra.mxu0 %v1443_v3 }
  0x71   :  { %464 = vmatpush.msra.mxu2 %v1011_v15  ;;  %411 = vmatmul.f32.vlgmr.msra.gmra.mxu0 %v1165_v44  ;;  %v1855_v15 = vld [vmem:[#allocation13_spill] sm:$0xff] }
  0x72   :  { %450 = vmatpush.msra.mxu1 %v1115_v50  ;;  %505 = vmatpush.msrb.mxu0 %v1023_v19  ;;  %v1858_v19 = vld [vmem:[#allocation46_spill] sm:$0xff]  ;;  %v1877_v50 = vld [vmem:[#allocation24_spill] sm:$0xff] }
  0x73   :  { %465 = vmatpush.msra.mxu2 %v1020_v18  ;;  %485 = vmatpush.msra.mxu3 %v1007_v13  ;;  %v1854_v13 = vld [vmem:[#allocation43_spill] sm:$0xff] }
  0x74   :  { %451 = vmatpush.msra.mxu1 %v1127_v54  ;;  %506 = vmatpush.msrb.mxu0 %v1029_v21  ;;  %v1857_v18 = vld [vmem:[#allocation23_spill] sm:$0xff]  ;;  %v1860_v21 = vld [vmem:[#allocation25_spill] sm:$0xff] }
  0x75   :  { %466 = vmatpush.msra.mxu2 %v1033_v23  ;;  %486 = vmatpush.msra.mxu3 %v1016_v16  ;;  %v1856_v16 = vld [vmem:[#allocation22_spill] sm:$0xff]  ;;  %v1879_v54 = vld [vmem:[#allocation41_spill] sm:$0xff] }
  0x76   :  { %528 = vmatpush.msrb.mxu1 %v1135_v56  ;;  %507 = vmatpush.msrb.mxu0 %v1041_v25  ;;  %v1861_v23 = vld [vmem:[#allocation26_spill] sm:$0xff]  ;;  %v1863_v25 = vld [vmem:[#allocation27_spill] sm:$0xff]  ;;  %v1880_v56 = vld [vmem:[#allocation28_spill] sm:$0xff] }
  0x77   :  { %467 = vmatpush.msra.mxu2 %v1045_v27  ;;  %487 = vmatpush.msra.mxu3 %v1027_v20  ;;  %v1859_v20 = vld [vmem:[#allocation14_spill] sm:$0xff]  ;;  %v1865_v27 = vld [vmem:[#allocation15_spill] sm:$0xff] }
  0x78   :  { %529 = vmatpush.msrb.mxu1 %v1147_v60  ;;  %508 = vmatpush.msrb.mxu0 %v1053_v29  ;;  %v1866_v29 = vld [vmem:[#allocation52_spill] sm:$0xff]  ;;  %v1882_v60 = vld [vmem:[#allocation45_spill] sm:$0xff] }
  0x79   :  { %468 = vmatpush.msra.mxu2 %v1057_v31  ;;  %414 = vmatmul.f32.gmra.mxu0 %v1213_v59  ;;  %v1868_v31 = vld [vmem:[#allocation32_spill] sm:$0xff] }
  0x7a   :  { %530 = vmatpush.msrb.mxu1 %v1157_v52  ;;  %509 = vmatpush.msrb.mxu0 %v1065_v33  ;;  %v1869_v33 = vld [vmem:[#allocation18_spill] sm:$0xff]  ;;  %v1878_v52 = vld [vmem:[#allocation36_spill] sm:$0xff] }
  0x7b   :  { %469 = vmatpush.msra.mxu2 %v1069_v35  ;;  %488 = vmatpush.msra.mxu3 %v1039_v24  ;;  %v1862_v24 = vld [vmem:[#allocation48_spill] sm:$0xff]  ;;  %v1871_v35 = vld [vmem:[#allocation33_spill] sm:$0xff] }
  0x7c   :  { %531 = vmatpush.msrb.mxu1 %v1169_v57  ;;  %510 = vmatpush.msrb.mxu0 %v1077_v37  ;;  %v1872_v37 = vld [vmem:[#allocation35_spill] sm:$0xff]  ;;  %v1881_v57 = vld [vmem:[#allocation40_spill] sm:$0xff] }
  0x7d   :  { %470 = vmatpush.msra.mxu2 %v1081_v39  ;;  %489 = vmatpush.msra.mxu3 %v1851_v9  ;;  %v1874_v39 = vld [vmem:[#allocation59_spill] sm:$0xff]  ;;  %v1888_v9 = vld [vmem:[#allocation57_spill] sm:$0xff] }
  0x7e   :  { %532 = vmatpush.msrb.mxu1 %v1181_v61  ;;  %511 = vmatpush.msrb.mxu0 %v1848_v5  ;;  %v1883_v61 = vld [vmem:[#allocation31_spill] sm:$0xff]  ;;  %v1884_v5 = vld [vmem:[#allocation50_spill] sm:$0xff] }
  0x7f   :  { %471 = vmatpush.msra.mxu2 %v1849_v6  ;;  %490 = vmatpush.msra.mxu3 %v1855_v15  ;;  %v1885_v6 = vld [vmem:[#allocation69_spill] sm:$0xff] }
  0x80   :  { %533 = vmatpush.msrb.mxu1 %v1850_v8  ;;  %512 = vmatpush.msrb.mxu0 %v1852_v10  ;;  %v1886_v8 = vld [vmem:[#allocation44_spill] sm:$0xff]  ;;  %v1893_v15 = vld [vmem:[#allocation49_spill] sm:$0xff] }
  0x81   :  { %472 = vmatpush.msra.mxu2 %v1853_v12  ;;  %491 = vmatpush.msra.mxu3 %v1859_v20  ;;  %v1889_v10 = vld [vmem:[#allocation72_spill] sm:$0xff]  ;;  %v1890_v12 = vld [vmem:[#allocation47_spill] sm:$0xff]  ;;  %v1897_v20 = vld [vmem:[#allocation54_spill] sm:$0xff] }
  0x82   :  { %534 = vmatpush.msrb.mxu1 %v1854_v13  ;;  %513 = vmatpush.msrb.mxu0 %v1856_v16  ;;  %v1892_v13 = vld [vmem:[#allocation61_spill] sm:$0xff]  ;;  %v1894_v16 = vld [vmem:[#allocation51_spill] sm:$0xff] }
  0x83   :  { %473 = vmatpush.msra.mxu2 %v1857_v18  ;;  %492 = vmatpush.msra.mxu3 %v1865_v27  ;;  %v1895_v18 = vld [vmem:[#allocation64_spill] sm:$0xff]  ;;  %v1903_v27 = vld [vmem:[#allocation63_spill] sm:$0xff] }
  0x84   :  { %535 = vmatpush.msrb.mxu1 %v1858_v19  ;;  %514 = vmatpush.msrb.mxu0 %v1860_v21  ;;  %v1896_v19 = vld [vmem:[#allocation53_spill] sm:$0xff]  ;;  %v1898_v21 = vld [vmem:[#allocation67_spill] sm:$0xff] }
  0x85   :  { %474 = vmatpush.msra.mxu2 %v1861_v23  ;;  %493 = vmatpush.msra.mxu3 %v1869_v33  ;;  %v1899_v23 = vld [vmem:[#allocation56_spill] sm:$0xff]  ;;  %v1907_v33 = vld [vmem:[#allocation81_spill] sm:$0xff] }
  0x86   :  { %536 = vmatpush.msrb.mxu1 %v1862_v24  ;;  %515 = vmatpush.msrb.mxu0 %v1864_v26  ;;  %v1900_v24 = vld [vmem:[#allocation58_spill] sm:$0xff] }
  0x87   :  { %551 = vmatpush.msrb.mxu2 %v1863_v25  ;;  %494 = vmatpush.msra.mxu3 %v1873_v38  ;;  %v1901_v25 = vld [vmem:[#allocation60_spill] sm:$0xff]  ;;  %v1902_v26 = vld [vmem:[#allocation62_spill] sm:$0xff]  ;;  %v1911_v38 = vld [vmem:[#allocation75_spill] sm:$0xff] }
  0x88   :  { %537 = vmatpush.msrb.mxu1 %v1866_v29  ;;  %516 = vmatpush.msrb.mxu0 %v1868_v31  ;;  %v1904_v29 = vld [vmem:[#allocation65_spill] sm:$0xff]  ;;  %v1906_v31 = vld [vmem:[#allocation68_spill] sm:$0xff] }
  0x89   :  { %552 = vmatpush.msrb.mxu2 %v1867_v30  ;;  %495 = vmatpush.msra.mxu3 %v1877_v50  ;;  %v1905_v30 = vld [vmem:[#allocation66_spill] sm:$0xff]  ;;  %v1915_v50 = vld [vmem:[#allocation85_spill] sm:$0xff] }
  0x8a   :  { %538 = vmatpush.msrb.mxu1 %v1870_v34  ;;  %517 = vmatpush.msrb.mxu0 %v1872_v37  ;;  %v1908_v34 = vld [vmem:[#allocation70_spill] sm:$0xff]  ;;  %v1910_v37 = vld [vmem:[#allocation73_spill] sm:$0xff] }
  0x8b   :  { %553 = vmatpush.msrb.mxu2 %v1871_v35  ;;  %496 = vmatpush.msra.mxu3 %v1880_v56  ;;  %v1909_v35 = vld [vmem:[#allocation71_spill] sm:$0xff] }
  0x8c   :  { %539 = vmatpush.msrb.mxu1 %v1874_v39  ;;  %518 = vmatpush.msrb.mxu0 %v1876_v46  ;;  %v1912_v39 = vld [vmem:[#allocation77_spill] sm:$0xff]  ;;  %v1914_v46 = vld [vmem:[#allocation83_spill] sm:$0xff] }
  0x8d   :  { %554 = vmatpush.msrb.mxu2 %v1875_v42  ;;  %497 = vmatpush.msra.mxu3 %v1883_v61  ;;  %v1913_v42 = vld [vmem:[#allocation79_spill] sm:$0xff] }
  0x8e   :  { %540 = vmatpush.msrb.mxu1 %v1275_v55  ;;  %519 = vmatpush.msrb.mxu0 %v1879_v54  ;;  %v1887_v55 = vld [vmem:[#allocation38_spill] sm:$0xff] }
  0x8f   :  { %555 = vmatpush.msrb.mxu2 %v1878_v52  ;;  %574 = vmatpush.msrb.mxu3 %v1887_v55  ;;  %v1916_v52 = vld [vmem:[#allocation87_spill] sm:$0xff] }
  0x90   :  { %541 = vmatpush.msrb.mxu1 %v1287_v45  ;;  %520 = vmatpush.msrb.mxu0 %v1882_v60  ;;  %v1891_v45 = vld [vmem:[#allocation42_spill] sm:$0xff] }
  0x91   :  { %556 = vmatpush.msrb.mxu2 %v1881_v57  ;;  %575 = vmatpush.msrb.mxu3 %v1891_v45 }
  0x92   :  { %597 = vmatpush.msra.mxu0 %v1884_v5  ;;  %542 = vmatpush.msrb.mxu1 %v1885_v6 }
  0x93   :  { %557 = vmatpush.msrb.mxu2 %v1886_v8  ;;  %576 = vmatpush.msrb.mxu3 %v1894_v16 }
  0x94   :  { %598 = vmatpush.msra.mxu0 %v1888_v9  ;;  %543 = vmatpush.msrb.mxu1 %v1889_v10 }
  0x95   :  { %558 = vmatpush.msrb.mxu2 %v1890_v12  ;;  %577 = vmatpush.msrb.mxu3 %v1897_v20  ;;  %v1918_v20 = vld [vmem:[#allocation76_spill] sm:$0xff] }
  0x96   :  { %599 = vmatpush.msra.mxu0 %v1892_v13 }
  0x97   :  { %559 = vmatpush.msrb.mxu2 %v1893_v15  ;;  %578 = vmatpush.msrb.mxu3 %v1900_v24 }
  0x98   :  { %600 = vmatpush.msra.mxu0 %v1895_v18 }
  0x99   :  { %560 = vmatpush.msrb.mxu2 %v1896_v19  ;;  %579 = vmatpush.msrb.mxu3 %v1902_v26  ;;  %v1920_v26 = vld [vmem:[#allocation80_spill] sm:$0xff] }
  0x9a   :  { %601 = vmatpush.msra.mxu0 %v1898_v21 }
  0x9b   :  { %561 = vmatpush.msrb.mxu2 %v1899_v23  ;;  %580 = vmatpush.msrb.mxu3 %v1904_v29 }
  0x9c   :  { %602 = vmatpush.msra.mxu0 %v1320_v53 }
  0x9d   :  { %562 = vmatpush.msrb.mxu2 %v1901_v25  ;;  %581 = vmatpush.msrb.mxu3 %v1906_v31  ;;  %v1922_v31 = vld [vmem:[#allocation84_spill] sm:$0xff] }
  0x9e   :  { %603 = vmatpush.msra.mxu0 %v1331_v36 }
  0x9f   :  { %563 = vmatpush.msrb.mxu2 %v1903_v27  ;;  %582 = vmatpush.msrb.mxu3 %v1909_v35  ;;  %v1921_v27 = vld [vmem:[#allocation82_spill] sm:$0xff] }
  0xa0   :  { %604 = vmatpush.msra.mxu0 %v1339_v51 }
  0xa1   :  { %564 = vmatpush.msrb.mxu2 %v1905_v30  ;;  %583 = vmatpush.msrb.mxu3 %v1911_v38 }
  0xa2   :  { %605 = vmatpush.msra.mxu0 %v1907_v33 }
  0xa3   :  { %565 = vmatpush.msrb.mxu2 %v1908_v34  ;;  %584 = vmatpush.msrb.mxu3 %v1912_v39  ;;  %v1923_v34 = vld [vmem:[#allocation86_spill] sm:$0xff] }
  0xa4   :  { %606 = vmatpush.msra.mxu0 %v1357_v0 }
  0xa5   :  { %566 = vmatpush.msrb.mxu2 %v1910_v37  ;;  %585 = vmatpush.msrb.mxu3 %v1913_v42 }
  0xa6   :  { %607 = vmatpush.msra.mxu0 %v1369_v49 }
  0xa7   :  { %586 = vmatpush.msrb.mxu3 %v1914_v46 }
  0xa8   :  { %608 = vmatpush.msra.mxu0 %v1377_v28 }
  0xa9   :  { %587 = vmatpush.msrb.mxu3 %v1915_v50 }
  0xaa   :  { %609 = vmatpush.msra.mxu0 %v1387_v41 }
  0xab   :  { %588 = vmatpush.msrb.mxu3 %v1916_v52  ;;  %v228_v54 = vpop.f32.mrf.mxu0 }
  0xac   :  { %610 = vmatpush.msra.mxu0 %v1397_v1 }
  0xad   :  { %589 = vmatpush.msrb.mxu3 %v1393_v48  ;;  %v1917_v48 = vld [vmem:[#allocation74_spill] sm:$0xff] }
  0xae   :  { %611 = vmatpush.msra.mxu0 %v1405_v11  ;;  %v251_v56 = vpop.f32.mrf.mxu1 }
  0xaf   :  { %v252_v57 = vadd.f32 %v251_v56, %v228_v54 }
  0xb0   :  { %612 = vmatpush.msra.mxu0 %v1413_v43 }
  0xb3   :  { %v274_v60 = vpop.f32.mrf.mxu2 }
  0xb4   :  { %v275_v61 = vadd.f32 %v274_v60, %v252_v57 }
  0xb6   :  { %v418_v6 = vmul.f32 0.020833334, %v275_v61 }
  0xb7   :  { %v231_v8 = vpop.f32.mrf.mxu0 }
  0xb8   :  { %v254_v55 = vpop.f32.mrf.mxu1  ;;  %v1562_v10 = vsub.f32 %v1167_v40, %v418_v6  ;;  %v1919_v40 = vld [vmem:[#allocation78_spill] sm:$0xff] }
  0xb9   :  { %v255_v12 = vadd.f32 %v254_v55, %v231_v8 }
  0xba   :  { %v1566_v45 = vmul.f32 %v1562_v10, %v1562_v10 }
  0xbb   :  { %v277_v15 = vpop.f32.mrf.mxu2 }
  0xbc   :  { %v278_v16 = vadd.f32 %v277_v15, %v255_v12  ;;  %452 = vmatmul.f32.vlgmr.msra.gmra.mxu1 %v1566_v45  ;;  %521 = vmatmul.f32.vlgmr.msrb.gmra.mxu0 %v1566_v45 }
  0xbd   :  { %620 = vmatpush.msra.mxu1 %v1917_v48 }
  0xbe   :  { %v421_v19 = vmul.f32 0.020833334, %v278_v16 }
  0xbf   :  { %621 = vmatpush.msra.mxu1 %v1918_v20 }
  0xc0   :  { %v1573_v23 = vsub.f32 %v1225_v63, %v421_v19 }
  0xc1   :  { %622 = vmatpush.msra.mxu1 %v1919_v40  ;;  %v297_v25 = vpop.f32.mrf.mxu3 }
  0xc2   :  { %v1578_v24 = vmul.f32 %v1573_v23, %v1573_v23 }
  0xc3   :  { %623 = vmatpush.msra.mxu1 %v1920_v26 }
  0xc4   :  { %455 = vmatmul.f32.gmra.mxu1 %v1578_v24  ;;  %524 = vmatmul.f32.gmra.mxu0 %v1578_v24 }
  0xc5   :  { %624 = vmatpush.msra.mxu1 %v1921_v27 }
  0xc7   :  { %625 = vmatpush.msra.mxu1 %v1922_v31 }
  0xc9   :  { %626 = vmatpush.msra.mxu1 %v1923_v34 }
  0xca   :  { %v300_v38 = vpop.f32.mrf.mxu3 }
  0xcb   :  { %v320_v29 = vpop.f32.mrf.mxu0  ;;  %627 = vmatpush.msra.mxu1 %v1385_v47 }
  0xcc   :  { %v343_v30 = vpop.f32.mrf.mxu1  ;;  %v321_v63 = vadd.f32 %v320_v29, %v297_v25 }
  0xcd   :  { %628 = vmatpush.msra.mxu1 %v1395_v7 }
  0xce   :  { %v344_v35 = vadd.f32 %v343_v30, %v321_v63  ;;  %v1653_v30 = vld [vmem:[#allocation5] sm:$0x3f] }
  0xcf   :  { %629 = vmatpush.msra.mxu1 %v1403_v32 }
  0xd0   :  { %v419_v37 = vmul.f32 0.020833334, %v344_v35 }
  0xd1   :  { %630 = vmatpush.msra.mxu1 %v1411_v4 }
  0xd2   :  { %v1589_v39 = vsub.f32 %v1177_v58, %v419_v37 }
  0xd3   :  { %631 = vmatpush.msra.mxu1 %v1419_v14 }
  0xd4   :  { %v323_v42 = vpop.f32.mrf.mxu0  ;;  %v431_v50 = vmul.f32 %v1589_v39, %v1589_v39 }
  0xd5   :  { %v324_v52 = vadd.f32 %v323_v42, %v300_v38  ;;  %632 = vmatpush.msra.mxu1 %v1426_v17  ;;  %v722_v38 = vperm.slane %v1653_v30, 0 }
  0xd6   :  { %v346_v46 = vpop.f32.mrf.mxu1  ;;  %475 = vmatmul.f32.vlgmr.msra.gmra.mxu2 %v431_v50  ;;  %544 = vmatmul.f32.vlgmr.msrb.gmra.mxu1 %v431_v50 }
  0xd7   :  { %v347_v54 = vadd.f32 %v346_v46, %v324_v52  ;;  %613 = vmatmul.f32.vlgmr.msra.gmra.mxu0 %v431_v50  ;;  %778 = vmatpush.msra.mxu2 %v1884_v5 }
  0xd8   :  { %633 = vmatpush.msra.mxu1 %v1431_v22 }
  0xd9   :  { %v422_v56 = vmul.f32 0.020833334, %v347_v54  ;;  %779 = vmatpush.msra.mxu2 %v1888_v9 }
  0xda   :  { %634 = vmatpush.msra.mxu1 %v1437_v2 }
  0xdb   :  { %v1599_v58 = vsub.f32 %v1227_v62, %v422_v56  ;;  %780 = vmatpush.msra.mxu2 %v1892_v13 }
  0xdc   :  { %635 = vmatpush.msra.mxu1 %v1443_v3 }
  0xdd   :  { %v434_v57 = vmul.f32 %v1599_v58, %v1599_v58  ;;  %781 = vmatpush.msra.mxu2 %v1895_v18 }
  0xdf   :  { %478 = vmatmul.f32.gmra.mxu2 %v434_v57  ;;  %547 = vmatmul.f32.gmra.mxu1 %v434_v57 }
  0xe0   :  { %782 = vmatpush.msra.mxu2 %v1898_v21 }
  0xe2   :  { %783 = vmatpush.msra.mxu2 %v1320_v53 }
  0xe4   :  { %784 = vmatpush.msra.mxu2 %v1331_v36 }
  0xe6   :  { %v366_v62 = vpop.f32.mrf.mxu2  ;;  %785 = vmatpush.msra.mxu2 %v1339_v51 }
  0xe8   :  { %786 = vmatpush.msra.mxu2 %v1907_v33 }
  0xea   :  { %787 = vmatpush.msra.mxu2 %v1357_v0 }
  0xeb   :  { %v389_v5 = vpop.f32.mrf.mxu3 }
  0xec   :  { %v390_v9 = vadd.f32 %v389_v5, %v366_v62  ;;  %788 = vmatpush.msra.mxu2 %v1369_v49  ;;  %v737_v62 = vperm.slane %v1653_v30, 1  ;;  %v723_v5 = vperm.slane %v1653_v30, 2 }
  0xee   :  { %v412_v13 = vpop.f32.mrf.mxu0  ;;  %v369_v21 = vpop.f32.mrf.mxu2  ;;  %789 = vmatpush.msra.mxu2 %v1377_v28 }
  0xef   :  { %v413_v18 = vadd.f32 %v412_v13, %v390_v9  ;;  %v728_v13 = vperm.slane %v722_v38, 0 }
  0xf0   :  { %790 = vmatpush.msra.mxu2 %v1387_v41 }
  0xf1   :  { %v420_v53 = vmul.f32 0.020833334, %v413_v18 }
  0xf2   :  { %791 = vmatpush.msra.mxu2 %v1397_v1 }
  0xf3   :  { %v392_v60 = vpop.f32.mrf.mxu3  ;;  %v1619_v36 = vsub.f32 %v1165_v44, %v420_v53 }
  0xf4   :  { %v393_v51 = vadd.f32 %v392_v60, %v369_v21  ;;  %792 = vmatpush.msra.mxu2 %v1405_v11 }
  0xf5   :  { %v432_v0 = vmul.f32 %v1619_v36, %v1619_v36 }
  0xf6   :  { %v415_v33 = vpop.f32.mrf.mxu0  ;;  %793 = vmatpush.msra.mxu2 %v1413_v43 }
  0xf7   :  { %v416_v49 = vadd.f32 %v415_v33, %v393_v51  ;;  %498 = vmatmul.f32.vlgmr.msra.gmra.mxu3 %v432_v0  ;;  %567 = vmatmul.f32.vlgmr.msrb.gmra.mxu2 %v432_v0  ;;  %v738_v51 = vperm.slane %v1653_v30, 3 }
  0xf8   :  { %636 = vmatmul.f32.vlgmr.msra.gmra.mxu1 %v432_v0  ;;  %794 = vmatpush.msra.mxu3 %v1917_v48 }
  0xf9   :  { %v423_v28 = vmul.f32 0.020833334, %v416_v49 }
  0xfa   :  { %795 = vmatpush.msra.mxu3 %v1918_v20 }
  0xfb   :  { %v1629_v41 = vsub.f32 %v1213_v59, %v423_v28 }
  0xfc   :  { %796 = vmatpush.msra.mxu3 %v1919_v40 }
  0xfd   :  { %v435_v44 = vmul.f32 %v1629_v41, %v1629_v41 }
  0xfe   :  { %797 = vmatpush.msra.mxu3 %v1920_v26 }
  0xff   :  { %501 = vmatmul.f32.gmra.mxu3 %v435_v44  ;;  %570 = vmatmul.f32.gmra.mxu2 %v435_v44 }
 0x100   :  { %798 = vmatpush.msra.mxu3 %v1921_v27 }
 0x102   :  { %799 = vmatpush.msra.mxu3 %v1922_v31 }
 0x104   :  { %800 = vmatpush.msra.mxu3 %v1923_v34 }
 0x106   :  { %801 = vmatpush.msra.mxu3 %v1385_v47 }
 0x107   :  { %590 = vmatmul.f32.vlgmr.msrb.gmra.mxu3 %v1566_v45  ;;  %616 = vmatmul.f32.vlgmr.msra.gmra.mxu2 %v434_v57 }
 0x108   :  { %802 = vmatpush.msra.mxu3 %v1395_v7 }
 0x10a   :  { %803 = vmatpush.msra.mxu3 %v1403_v32 }
 0x10c   :  { %804 = vmatpush.msra.mxu3 %v1411_v4 }
 0x10e   :  { %805 = vmatpush.msra.mxu3 %v1419_v14 }
 0x10f   :  { %593 = vmatmul.f32.gmra.mxu3 %v1578_v24 }
 0x110   :  { %806 = vmatpush.msra.mxu3 %v1426_v17 }
 0x112   :  { %807 = vmatpush.msra.mxu3 %v1431_v22 }
 0x114   :  { %808 = vmatpush.msra.mxu3 %v1437_v2 }
 0x116   :  { %809 = vmatpush.msra.mxu3 %v1443_v3 }
 0x117   :  { %639 = vmatmul.f32.vlgmr.msra.gmra.mxu3 %v435_v44 }
 0x139   :  { %v453_v43 = vpop.f32.mrf.mxu1  ;;  %v522_v7 = vpop.f32.mrf.mxu0 }
 0x141   :  { %v456_v59 = vpop.f32.mrf.mxu1  ;;  %v525_v45 = vpop.f32.mrf.mxu0 }
 0x153   :  { %v545_v32 = vpop.f32.mrf.mxu1 }
 0x154   :  { %v546_v4 = vadd.f32 %v545_v32, %v522_v7  ;;  %v614_v34 = vpop.f32.mrf.mxu0 }
 0x159   :  { %v476_v47 = vpop.f32.mrf.mxu2 }
 0x15a   :  { %v477_v11 = vadd.f32 %v476_v47, %v453_v43  ;;  %v743_v43 = vperm.slane %v737_v62, 1  ;;  %v729_v47 = vperm.slane %v723_v5, 0 }
 0x15c   :  { %v548_v22 = vpop.f32.mrf.mxu1 }
 0x15d   :  { %v549_v3 = vadd.f32 %v548_v22, %v525_v45 }
 0x162   :  { %v479_v1 = vpop.f32.mrf.mxu2 }
 0x163   :  { %v480_v15 = vadd.f32 %v479_v1, %v456_v59 }
 0x175   :  { %v637_v50 = vpop.f32.mrf.mxu1 }
 0x17a   :  { %v499_v14 = vpop.f32.mrf.mxu3  ;;  %v568_v61 = vpop.f32.mrf.mxu2 }
 0x17b   :  { %v500_v6 = vadd.f32 %v499_v14, %v477_v11  ;;  %v569_v8 = vadd.f32 %v568_v61, %v546_v4  ;;  %v744_v14 = vperm.slane %v738_v51, 1 }
 0x17d   :  { %v643_v17 = vmul.f32 0.020833334, %v500_v6  ;;  %v644_v55 = vmul.f32 0.020833334, %v569_v8 }
 0x17f   :  { %v649_v12 = vadd.f32 1e-05, %v643_v17  ;;  %v650_v2 = vadd.f32 1e-05, %v644_v55 }
 0x181   :  { %816 = vrsqrt.f32 %v649_v12  ;;  %vm661_vm2 = vweird.f32 %v649_v12  ;;  %vm671_vm4 = vweird.f32 %v650_v2 }
 0x182   :  { %818 = vrsqrt.f32 %v650_v2  ;;  %v502_v16 = vpop.f32.mrf.mxu3  ;;  %v571_v48 = vpop.f32.mrf.mxu2 }
 0x183   :  { %v503_v19 = vadd.f32 %v502_v16, %v480_v15  ;;  %v572_v20 = vadd.f32 %v571_v48, %v549_v3 }
 0x185   :  { %v646_v40 = vmul.f32 0.020833334, %v503_v19  ;;  %v647_v24 = vmul.f32 0.020833334, %v572_v20 }
 0x187   :  { %v817_v25 = vpop.eup %816  ;;  %v1649_v26 = vadd.f32 1e-05, %v646_v40  ;;  %v1651_v27 = vadd.f32 1e-05, %v647_v24 }
 0x188   :  { %v819_v29 = vpop.eup %818  ;;  %v656_v31 = vmul.f32 %v817_v25, %v649_v12  ;;  %vm662_vm0 = vweird.f32 %v817_v25 }
 0x189   :  { %v666_v63 = vmul.f32 %v819_v29, %v650_v2  ;;  %820 = vrsqrt.f32 %v1649_v26  ;;  %vm672_vm1 = vweird.f32 %v819_v29  ;;  %vm663_vm3 = vmor %vm661_vm2, %vm662_vm0  ;;  %vm691_vm8 = vweird.f32 %v1649_v26 }
 0x18a   :  { %v657_v35 = vmul.f32 %v817_v25, %v656_v31  ;;  %822 = vrsqrt.f32 %v1651_v27  ;;  %v591_v37 = vpop.f32.mrf.mxu3  ;;  %vm673_vm5 = vmor %vm671_vm4, %vm672_vm1  ;;  %vm701_vm10 = vweird.f32 %v1651_v27 }
 0x18b   :  { %v667_v42 = vmul.f32 %v819_v29, %v666_v63  ;;  %v615_v46 = vadd.f32 %v614_v34, %v591_v37 }
 0x18c   :  { %v658_v52 = vmul.f32 0.5, %v657_v35 }
 0x18d   :  { %v668_v54 = vmul.f32 0.5, %v667_v42  ;;  %v638_v56 = vadd.f32 %v637_v50, %v615_v46  ;;  %v739_v46 = vperm.slane %v1653_v30, 5 }
 0x18e   :  { %v659_v57 = vsub.f32 1.5, %v658_v52 }
 0x18f   :  { %v821_v9 = vpop.eup %820  ;;  %v669_v18 = vsub.f32 1.5, %v668_v54  ;;  %v645_v21 = vmul.f32 0.020833334, %v638_v56  ;;  %v745_v54 = vperm.slane %v739_v46, 1 }
 0x190   :  { %v823_v53 = vpop.eup %822  ;;  %v660_v60 = vmul.f32 %v817_v25, %v659_v57  ;;  %v686_v0 = vmul.f32 %v821_v9, %v1649_v26  ;;  %vm692_vm6 = vweird.f32 %v821_v9 }
 0x191   :  { %v670_v33 = vmul.f32 %v819_v29, %v669_v18  ;;  %v696_v49 = vmul.f32 %v823_v53, %v1651_v27  ;;  %v651_v28 = vadd.f32 1e-05, %v645_v21  ;;  %vm702_vm7 = vweird.f32 %v823_v53  ;;  %vm693_vm9 = vmor %vm691_vm8, %vm692_vm6 }
 0x192   :  { %v664_v44 = vsel %vm663_vm3, %v817_v25, %v660_v60  ;;  %v687_v59 = vmul.f32 %v821_v9, %v686_v0  ;;  %v594_v1 = vpop.f32.mrf.mxu3  ;;  %vm703_vm11 = vmor %vm701_vm10, %vm702_vm7  ;;  %v724_v27 = vperm.slane %v1653_v30, 4 }
 0x193   :  { %v715_v32 = vmul.f32 %v664_v44, %v1562_v10  ;;  %v674_v7 = vsel %vm673_vm5, %v819_v29, %v670_v33  ;;  %v697_v4 = vmul.f32 %v823_v53, %v696_v49  ;;  %824 = vrsqrt.f32 %v651_v28  ;;  %v617_v10 = vpop.f32.mrf.mxu2 }
 0x194   :  { %v716_v11 = vmul.f32 %v674_v7, %v1589_v39  ;;  %v688_v61 = vmul.f32 0.5, %v687_v59  ;;  %v618_v39 = vadd.f32 %v617_v10, %v594_v1  ;;  %vm681_vm13 = vweird.f32 %v651_v28 }
 0x195   :  { %v731_v6 = vmul.f32 %v728_v13, %v715_v32  ;;  %v698_v8 = vmul.f32 0.5, %v697_v4 }
 0x196   :  { %v732_v17 = vmul.f32 %v729_v47, %v716_v11  ;;  %v689_v55 = vsub.f32 1.5, %v688_v61 }
 0x197   :  { %v746_v22 = vadd.f32 %v743_v43, %v731_v6  ;;  %v699_v12 = vsub.f32 1.5, %v698_v8 }
 0x198   :  { %v747_v2 = vadd.f32 %v744_v14, %v732_v17  ;;  %v690_v45 = vmul.f32 %v821_v9, %v689_v55 }
 0x199   :  { %v825_v3 = vpop.eup %824  ;;  %752 = vst [vmem:[#allocation8] sm:$0xff] %v746_v22  ;;  %v700_v15 = vmul.f32 %v823_v53, %v699_v12 }
 0x19a   :  { %753 = vst [vmem:[#allocation8 + $0x8] sm:$0xff] %v747_v2  ;;  %v694_v16 = vsel %vm693_vm9, %v821_v9, %v690_v45  ;;  %v676_v48 = vmul.f32 %v825_v3, %v651_v28  ;;  %v640_v19 = vpop.f32.mrf.mxu3  ;;  %vm682_vm12 = vweird.f32 %v825_v3 }
 0x19b   :  { %v718_v20 = vmul.f32 %v694_v16, %v1573_v23  ;;  %v704_v40 = vsel %vm703_vm11, %v823_v53, %v700_v15  ;;  %v641_v24 = vadd.f32 %v640_v19, %v618_v39  ;;  %vm683_vm14 = vmor %vm681_vm13, %vm682_vm12 }
 0x19c   :  { %v719_v25 = vmul.f32 %v704_v40, %v1599_v58  ;;  %v677_v26 = vmul.f32 %v825_v3, %v676_v48  ;;  %v730_v58 = vperm.slane %v724_v27, 0 }
 0x19d   :  { %v734_v29 = vmul.f32 %v728_v13, %v718_v20  ;;  %v648_v31 = vmul.f32 0.020833334, %v641_v24 }
 0x19e   :  { %v735_v63 = vmul.f32 %v729_v47, %v719_v25  ;;  %v678_v34 = vmul.f32 0.5, %v677_v26 }
 0x19f   :  { %v749_v35 = vadd.f32 %v743_v43, %v734_v29  ;;  %v654_v37 = vadd.f32 1e-05, %v648_v31 }
 0x1a0   :  { %v750_v38 = vadd.f32 %v744_v14, %v735_v63  ;;  %v679_v42 = vsub.f32 1.5, %v678_v34 }
 0x1a1   :  { %755 = vst [vmem:[#allocation8 + $0x18] sm:$0xff] %v749_v35  ;;  %826 = vrsqrt.f32 %v654_v37  ;;  %vm711_vm0 = vweird.f32 %v654_v37 }
 0x1a2   :  { %756 = vst [vmem:[#allocation8 + $0x20] sm:$0xff] %v750_v38  ;;  %v680_v23 = vmul.f32 %v825_v3, %v679_v42 }
 0x1a4   :  { %v684_v50 = vsel %vm683_vm14, %v825_v3, %v680_v23 }
 0x1a5   :  { %v717_v52 = vmul.f32 %v684_v50, %v1619_v36 }
 0x1a7   :  { %v827_v56 = vpop.eup %826  ;;  %v733_v57 = vmul.f32 %v730_v58, %v717_v52 }
 0x1a8   :  { %v706_v62 = vmul.f32 %v827_v56, %v654_v37  ;;  %vm712_vm15 = vweird.f32 %v827_v56 }
 0x1a9   :  { %v748_v5 = vadd.f32 %v745_v54, %v733_v57  ;;  %vm713_vm1 = vmor %vm711_vm0, %vm712_vm15 }
 0x1aa   :  { %v707_v9 = vmul.f32 %v827_v56, %v706_v62 }
 0x1ab   :  { %754 = vst [vmem:[#allocation8 + $0x10] sm:$0xff] %v748_v5 }
 0x1ac   :  { %v708_v13 = vmul.f32 0.5, %v707_v9 }
 0x1ae   :  { %v709_v18 = vsub.f32 1.5, %v708_v13 }
 0x1b0   :  { %v710_v30 = vmul.f32 %v827_v56, %v709_v18 }
 0x1b2   :  { %v714_v21 = vsel %vm713_vm1, %v827_v56, %v710_v30 }
 0x1b3   :  { %v720_v53 = vmul.f32 %v714_v21, %v1629_v41 }
 0x1b5   :  { %v736_v36 = vmul.f32 %v730_v58, %v720_v53 }
 0x1b7   :  { %v751_v60 = vadd.f32 %v745_v54, %v736_v36 }
 0x1b9   :  { %757 = vst [vmem:[#allocation8 + $0x28] sm:$0xff] %v751_v60 }
 0x1ba   :  { %770 = dma.vmem_to_hbm [thread:$0]  %s763_s2, 768, %s765_s30, [#allocation4], %s932_s22, %s932_s22, %s933_s23  }
 0x1bb   :  { %928 = dma.done.wait [#allocation4], 768  }
 0x1bc   :  { %929 = vsyncadd [#allocation4], 4294966528 }
 0x1bd   :  { %775 = vsyncpa [#allocation3], 1 }
 0x1be   :  { %776 = vsyncpa [#allocation6], 1 }
 0x1bf   :  { %777 = vsyncpa [#allocation4], 1 }

</bundles_post_ra>
